<compile_context>
chip_gen: v7x
topology: tpu7x:2x2x1
jax: 0.10.0
libtpu: 0.0.40
codegen_flags: <defaults>
</compile_context>

<pallas_src>
import functools

import jax
import jax.numpy as jnp
from jax.experimental import pallas as pl
from jax.experimental.pallas import tpu as pltpu


def _round_up(x, m):
    return ((x + m - 1) // m) * m


def _bf16_tanh_default():
    """bf16 tanh on v6e/v7x (bf16 EUP); f32 tanh path on v5e (no bf16 EUP)."""
    try:
        kind = jax.devices()[0].device_kind.lower()
    except Exception:
        return True
    return not ("v5e" in kind or "v5 lite" in kind or "v5lite" in kind)


def _actor_kernel(x_ref, w1_ref, b1_ref, w2_ref, b2_ref, w3_ref, b3_ref,
                  out_ref, *, bf16_tanh):
    # x: [TB, S] f32 tile.  w1: f32 (S, W).  w2/w3: bf16 (in, out).  b*: f32 (1, out).
    x = x_ref[...]

    # Layer 1: f32 matmul.  K = state_dim is tiny (one MXU pass regardless of
    # dtype); skipping the bf16 pack of the lane-sparse input saves VPU work.
    h1 = jnp.dot(x, w1_ref[...], preferred_element_type=jnp.float32) + b1_ref[...]
    if bf16_tanh:
        a1 = jnp.tanh(h1.astype(jnp.bfloat16))          # bf16 EUP (v6e/v7x)
    else:
        a1 = jnp.tanh(h1).astype(jnp.bfloat16)          # f32 EUP path (v5e)

    # Layer 2: bf16 MXU operands, f32 accumulation.
    h2 = jnp.dot(a1, w2_ref[...], preferred_element_type=jnp.float32) + b2_ref[...]
    if bf16_tanh:
        a2 = jnp.tanh(h2.astype(jnp.bfloat16))
    else:
        a2 = jnp.tanh(h2).astype(jnp.bfloat16)

    # Logits head (padded to 128 lanes -> unmasked, lane-dense store).
    logits = jnp.dot(a2, w3_ref[...], preferred_element_type=jnp.float32) + b3_ref[...]
    out_ref[...] = logits.astype(out_ref.dtype)          # bf16 output stream


def categorical_actor_forward(state, params, block_b=2048, bf16_tanh=None):
    """Forward pass of CategoricalActor.

    state: [B, state_dim] f32.  params: (in, out) weights / (1, out) biases (f32).

    Returns the PADDED bf16 logits [B_pad, A_pad] (A_pad = 128-lane padded
    action dim).  Lanes >= action_dim hold -1e30, so softmax / argmax /
    Categorical over the padded lane axis is correct with no slicing; rows
    >= B are batch padding.  Slice [:B, :action_dim] only if a dense view is
    really needed (it costs an extra HBM round-trip).
    """
    B, S = state.shape
    A = params["w3"].shape[1]
    if bf16_tanh is None:
        bf16_tanh = _bf16_tanh_default()

    # Lane-dense output head: pad action_dim up to a multiple of 128 lanes.
    A_pad = max(128, _round_up(A, 128))

    # 2-TensorCore-aware batch tile (v7x): aim for a grid of >= 2 steps when
    # there is enough work; multiple of 16 rows for bf16 sublane packing.
    tb = min(block_b, max(16, _round_up(pl.cdiv(B, 2), 16)))
    tb = _round_up(tb, 16)
    B_pad = _round_up(B, tb)

    x = state.astype(jnp.float32)
    if B_pad != B:
        x = jnp.pad(x, ((0, B_pad - B), (0, 0)))

    # Layer 1 stays f32; layers 2/3 use bf16 MXU operands (f32 accumulation).
    w1 = params["w1"].astype(jnp.float32)
    w2 = params["w2"].astype(jnp.bfloat16)
    w3 = params["w3"].astype(jnp.bfloat16)
    b1 = params["b1"].astype(jnp.float32)
    b2 = params["b2"].astype(jnp.float32)
    b3 = params["b3"].astype(jnp.float32)
    if A_pad != A:
        w3 = jnp.pad(w3, ((0, 0), (0, A_pad - A)))
        # Large-negative bias on padded lanes -> downstream softmax/argmax over
        # the full padded lane axis is correct without any re-slice.
        b3 = jnp.pad(b3, ((0, 0), (0, A_pad - A)), constant_values=-1e30)

    grid = (B_pad // tb,)

    # Weights/biases: same block every grid step -> VMEM-resident.
    resident = lambda a: pl.BlockSpec(a.shape, lambda i: (0, 0))

    compiler_kwargs = dict(dimension_semantics=("parallel",))  # megacore / 2-TC split
    if tb >= 4096:
        # f32 h1/h2 intermediates + double-buffered I/O approach the default
        # scoped-VMEM limit once tiles get this big.
        compiler_kwargs["vmem_limit_bytes"] = 64 * 1024 * 1024

    kernel = functools.partial(_actor_kernel, bf16_tanh=bool(bf16_tanh))

    out = pl.pallas_call(
        kernel,
        out_shape=jax.ShapeDtypeStruct((B_pad, A_pad), jnp.bfloat16),
        grid=grid,
        in_specs=[
            pl.BlockSpec((tb, S), lambda i: (i, 0)),   # state tile, pipelined
            resident(w1), resident(b1),
            resident(w2), resident(b2),
            resident(w3), resident(b3),
        ],
        out_specs=pl.BlockSpec((tb, A_pad), lambda i: (i, 0)),
        compiler_params=pltpu.CompilerParams(**compiler_kwargs),
    )(x, w1, b1, w2, b2, w3, b3)

    return out


def init_params(key, state_dim, action_dim, net_width=128):
    """Deterministic init mimicking nn.Linear's U(-1/sqrt(fan_in), 1/sqrt(fan_in)).
    Weights stored as (in, out)."""
    ks = jax.random.split(key, 6)

    def linear(kw, kb, fan_in, fan_out):
        bound = 1.0 / jnp.sqrt(jnp.float32(fan_in))
        w = jax.random.uniform(kw, (fan_in, fan_out), jnp.float32, -bound, bound)
        b = jax.random.uniform(kb, (1, fan_out), jnp.float32, -bound, bound)
        return w, b

    w1, b1 = linear(ks[0], ks[1], state_dim, net_width)
    w2, b2 = linear(ks[2], ks[3], net_width, net_width)
    w3, b3 = linear(ks[4], ks[5], net_width, action_dim)
    return {"w1": w1, "b1": b1, "w2": w2, "b2": b2, "w3": w3, "b3": b3}


def reference_forward_matched(state, p, bf16_tanh):
    """Reference with the same per-layer dtypes / accumulation as the kernel."""
    bf = jnp.bfloat16
    h1 = jnp.dot(state.astype(jnp.float32), p["w1"].astype(jnp.float32),
                 preferred_element_type=jnp.float32) + p["b1"]
    a1 = jnp.tanh(h1.astype(bf)) if bf16_tanh else jnp.tanh(h1).astype(bf)
    h2 = jnp.dot(a1, p["w2"].astype(bf),
                 preferred_element_type=jnp.float32) + p["b2"]
    a2 = jnp.tanh(h2.astype(bf)) if bf16_tanh else jnp.tanh(h2).astype(bf)
    logits = jnp.dot(a2, p["w3"].astype(bf),
                     preferred_element_type=jnp.float32) + p["b3"]
    return logits.astype(bf)


def reference_forward_f32(state, p):
    h1 = jnp.tanh(state @ p["w1"] + p["b1"])
    h2 = jnp.tanh(h1 @ p["w2"] + p["b2"])
    return h2 @ p["w3"] + p["b3"]


if __name__ == "__main__":
    key = jax.random.PRNGKey(0)
    k_param, k_state = jax.random.split(key)

    batch = 8
    state_dim = 8
    action_dim = 4
    net_width = 128

    params = init_params(k_param, state_dim, action_dim, net_width)
    state = jax.random.normal(k_state, (batch, state_dim), jnp.float32)

    bf16_tanh = _bf16_tanh_default()
    padded = categorical_actor_forward(state, params, bf16_tanh=bf16_tanh)
    padded = jax.block_until_ready(padded)

    assert padded.dtype == jnp.bfloat16
    assert padded.shape[1] == 128 and padded.shape[0] >= batch

    # Padded action lanes carry a huge negative bias -> softmax/argmax over the
    # full 128 lanes stays correct without slicing.
    assert bool(jnp.all(padded[:batch, action_dim:].astype(jnp.float32) < -1e29))

    # Verification-only slice (the hot path keeps the padded layout).
    logits = padded[:batch, :action_dim].astype(jnp.float32)
    assert logits.shape == (batch, action_dim)

    # Tight check vs a reference doing identical per-layer dtype math.
    ref_match = reference_forward_matched(state, params, bf16_tanh).astype(jnp.float32)
    assert jnp.allclose(logits, ref_match, atol=2e-2, rtol=2e-2), "mismatch vs matched reference"

    # Loose sanity check vs the pure-f32 PyTorch-equivalent forward.
    ref_f32 = reference_forward_f32(state, params)
    assert jnp.allclose(logits, ref_f32, atol=5e-2, rtol=5e-2), "mismatch vs f32 reference"

    print("KERNEL_OK")
</pallas_src>

<mosaic_0001>
module attributes {stable_mosaic.version = 11 : i64} {
  func.func @_actor_kernel(%arg0: i32, %arg1: memref<16x8xf32, #tpu.memory_space<vmem>>, %arg2: memref<8x128xf32, #tpu.memory_space<vmem>>, %arg3: memref<1x128xf32, #tpu.memory_space<vmem>>, %arg4: memref<128x128xbf16, #tpu.memory_space<vmem>>, %arg5: memref<1x128xf32, #tpu.memory_space<vmem>>, %arg6: memref<128x128xbf16, #tpu.memory_space<vmem>>, %arg7: memref<1x128xf32, #tpu.memory_space<vmem>>, %arg8: memref<16x128xbf16, #tpu.memory_space<vmem>>) attributes {dimension_semantics = [#tpu.dimension_semantics<parallel>], iteration_bounds = array<i64: 1>, scalar_prefetch = 0 : i64, scratch_operands = 0 : i64, tpu.core_type = #tpu.core_type<tc>, window_params = [{transform_indices = @transform_0, window_bounds = array<i64: 16, 8>}, {pipeline_mode = #tpu.pipeline_mode<synchronous>, transform_indices = @transform_1, window_bounds = array<i64: 8, 128>}, {pipeline_mode = #tpu.pipeline_mode<synchronous>, transform_indices = @transform_2, window_bounds = array<i64: 1, 128>}, {pipeline_mode = #tpu.pipeline_mode<synchronous>, transform_indices = @transform_3, window_bounds = array<i64: 128, 128>}, {pipeline_mode = #tpu.pipeline_mode<synchronous>, transform_indices = @transform_4, window_bounds = array<i64: 1, 128>}, {pipeline_mode = #tpu.pipeline_mode<synchronous>, transform_indices = @transform_5, window_bounds = array<i64: 128, 128>}, {pipeline_mode = #tpu.pipeline_mode<synchronous>, transform_indices = @transform_6, window_bounds = array<i64: 1, 128>}, {transform_indices = @transform_7, window_bounds = array<i64: 16, 128>}]} {
    %c0 = arith.constant 0 : index
    %c0_0 = arith.constant 0 : index
    %0 = vector.load %arg1[%c0, %c0_0] : memref<16x8xf32, #tpu.memory_space<vmem>>, vector<16x8xf32>
    %c0_1 = arith.constant 0 : index
    %c0_2 = arith.constant 0 : index
    %1 = vector.load %arg2[%c0_1, %c0_2] : memref<8x128xf32, #tpu.memory_space<vmem>>, vector<8x128xf32>
    %cst = arith.constant dense<0.000000e+00> : vector<16x128xf32>
    %2 = tpu.matmul %0, %1, %cst {dimension_numbers = #tpu.dot_dimension_numbers<[1], [0], [0], [1], [0, 0, 1, 1], [], []>} : vector<16x8xf32>, vector<8x128xf32>, vector<16x128xf32> -> vector<16x128xf32>
    %c0_3 = arith.constant 0 : index
    %c0_4 = arith.constant 0 : index
    %3 = vector.load %arg3[%c0_3, %c0_4] : memref<1x128xf32, #tpu.memory_space<vmem>>, vector<1x128xf32>
    %4 = vector.broadcast %3 : vector<1x128xf32> to vector<16x128xf32>
    %5 = arith.addf %2, %4 : vector<16x128xf32>
    %6 = arith.truncf %5 : vector<16x128xf32> to vector<16x128xbf16>
    %7 = math.tanh %6 : vector<16x128xbf16>
    %c0_5 = arith.constant 0 : index
    %c0_6 = arith.constant 0 : index
    %8 = vector.load %arg4[%c0_5, %c0_6] : memref<128x128xbf16, #tpu.memory_space<vmem>>, vector<128x128xbf16>
    %cst_7 = arith.constant dense<0.000000e+00> : vector<16x128xf32>
    %9 = tpu.matmul %7, %8, %cst_7 {dimension_numbers = #tpu.dot_dimension_numbers<[1], [0], [0], [1], [0, 0, 1, 1], [], []>} : vector<16x128xbf16>, vector<128x128xbf16>, vector<16x128xf32> -> vector<16x128xf32>
    %c0_8 = arith.constant 0 : index
    %c0_9 = arith.constant 0 : index
    %10 = vector.load %arg5[%c0_8, %c0_9] : memref<1x128xf32, #tpu.memory_space<vmem>>, vector<1x128xf32>
    %11 = vector.broadcast %10 : vector<1x128xf32> to vector<16x128xf32>
    %12 = arith.addf %9, %11 : vector<16x128xf32>
    %13 = arith.truncf %12 : vector<16x128xf32> to vector<16x128xbf16>
    %14 = math.tanh %13 : vector<16x128xbf16>
    %c0_10 = arith.constant 0 : index
    %c0_11 = arith.constant 0 : index
    %15 = vector.load %arg6[%c0_10, %c0_11] : memref<128x128xbf16, #tpu.memory_space<vmem>>, vector<128x128xbf16>
    %cst_12 = arith.constant dense<0.000000e+00> : vector<16x128xf32>
    %16 = tpu.matmul %14, %15, %cst_12 {dimension_numbers = #tpu.dot_dimension_numbers<[1], [0], [0], [1], [0, 0, 1, 1], [], []>} : vector<16x128xbf16>, vector<128x128xbf16>, vector<16x128xf32> -> vector<16x128xf32>
    %c0_13 = arith.constant 0 : index
    %c0_14 = arith.constant 0 : index
    %17 = vector.load %arg7[%c0_13, %c0_14] : memref<1x128xf32, #tpu.memory_space<vmem>>, vector<1x128xf32>
    %18 = vector.broadcast %17 : vector<1x128xf32> to vector<16x128xf32>
    %19 = arith.addf %16, %18 : vector<16x128xf32>
    %20 = arith.truncf %19 : vector<16x128xf32> to vector<16x128xbf16>
    %c0_15 = arith.constant 0 : index
    %c0_16 = arith.constant 0 : index
    %21 = vector.load %arg8[%c0_15, %c0_16] : memref<16x128xbf16, #tpu.memory_space<vmem>>, vector<16x128xbf16>
    tpu.vector_store %arg8[%c0_15, %c0_16], %20 {strides = array<i32>} : memref<16x128xbf16, #tpu.memory_space<vmem>>, vector<16x128xbf16>,
    return
  }
  func.func @transform_0(%arg0: i32) -> (i32, i32) {
    %c0_i32 = arith.constant 0 : i32
    %c0_i32_0 = arith.constant 0 : i32
    return %arg0, %c0_i32 : i32, i32
  }
  func.func @transform_1(%arg0: i32) -> (i32, i32) {
    %c0_i32 = arith.constant 0 : i32
    %c0_i32_0 = arith.constant 0 : i32
    %c0_i32_1 = arith.constant 0 : i32
    return %c0_i32, %c0_i32_0 : i32, i32
  }
  func.func @transform_2(%arg0: i32) -> (i32, i32) {
    %c0_i32 = arith.constant 0 : i32
    %c0_i32_0 = arith.constant 0 : i32
    %c0_i32_1 = arith.constant 0 : i32
    return %c0_i32, %c0_i32_0 : i32, i32
  }
  func.func @transform_3(%arg0: i32) -> (i32, i32) {
    %c0_i32 = arith.constant 0 : i32
    %c0_i32_0 = arith.constant 0 : i32
    %c0_i32_1 = arith.constant 0 : i32
    return %c0_i32, %c0_i32_0 : i32, i32
  }
  func.func @transform_4(%arg0: i32) -> (i32, i32) {
    %c0_i32 = arith.constant 0 : i32
    %c0_i32_0 = arith.constant 0 : i32
    %c0_i32_1 = arith.constant 0 : i32
    return %c0_i32, %c0_i32_0 : i32, i32
  }
  func.func @transform_5(%arg0: i32) -> (i32, i32) {
    %c0_i32 = arith.constant 0 : i32
    %c0_i32_0 = arith.constant 0 : i32
    %c0_i32_1 = arith.constant 0 : i32
    return %c0_i32, %c0_i32_0 : i32, i32
  }
  func.func @transform_6(%arg0: i32) -> (i32, i32) {
    %c0_i32 = arith.constant 0 : i32
    %c0_i32_0 = arith.constant 0 : i32
    %c0_i32_1 = arith.constant 0 : i32
    return %c0_i32, %c0_i32_0 : i32, i32
  }
  func.func @transform_7(%arg0: i32) -> (i32, i32) {
    %c0_i32 = arith.constant 0 : i32
    %c0_i32_0 = arith.constant 0 : i32
    return %arg0, %c0_i32 : i32, i32
  }
}

</mosaic_0001>

<bundles_post_ra>
// kernel: tpu_custom_call.1
= control target key start
LH: loop header
LB: loop body
LE: loop exit
PB: predicated region body
PF: predicated region fallthrough
CT: control target
= control target key end

     0   :  { %12 = vsyncpa [#allocation3], 0  ;;  %s727_s0 = inlined_call_operand.vmem [shape: f32[16,8], index: 0, kind: input, shape index: {}]   ;;  %s728_s1 = inlined_call_operand.vmem [shape: f32[8,128], index: 1, kind: input, shape index: {}]   ;;  %s729_s2 = inlined_call_operand.vmem [shape: f32[1,128], index: 2, kind: input, shape index: {}]   ;;  %s730_s3 = inlined_call_operand.hbm [shape: bf16[128,128], index: 3, kind: input, shape index: {}]   ;;  %s731_s4 = inlined_call_operand.vmem [shape: f32[1,128], index: 4, kind: input, shape index: {}]   ;;  %s732_s5 = inlined_call_operand.hbm [shape: bf16[128,128], index: 5, kind: input, shape index: {}]   ;;  %s733_s6 = inlined_call_operand.vmem [shape: f32[1,128], index: 6, kind: input, shape index: {}]   ;;  %s734_s7 = inlined_call_operand.hbm [shape: bf16[16,128], index: 7, kind: output, shape index: {}]  }
   0x1   :  { %13 = vsyncpa [#allocation6], 0 }
   0x2   :  { %14 = vsyncpa [#allocation4], 0  ;;  %s599_s24 = smov [#allocation2]   ;;  %s527_s28 = scalar_lea.hbm %s730_s3, 1024 }
   0x3   :  { %s26_s25 = sshll.u32 %s599_s24, 4  ;;  %p528_p0 = scmp.ne.s32.totalorder %s730_s3, %s527_s28  ;;  %s27_s25 = int_to_ptr.vmem [resolvable:$true] %s26_s25 }
   0x4   :  { %p531_p1 = scmp.lt.u32.totalorder %s527_s28, %s730_s3 }
   0x6   :  { %p533_p2 = pnand %p531_p1, %p528_p0 }
   0x8   :  { %536 = shalt.err (!%p533_p2)
}
   0x9   :  { %s537_s10 = scalar_lea.vmem %s27_s25, 1024  ;;  %p542_p4 = scmp.lt.s32.totalorder %s27_s25, %s27_s25 }
   0xa   :  { %p538_p3 = scmp.ne.s32.totalorder %s27_s25, %s537_s10  ;;  %p543_p5 = scmp.lt.s32.totalorder %s537_s10, %s537_s10 }
   0xc   :  { %p544_p6 = por %p543_p5, %p542_p4 }
   0xe   :  { %p545_p7 = pnand %p544_p6, %p538_p3 }
  0x10   :  { %548 = shalt.err (!%p545_p7)
}
  0x11   :  { %s600_s11 = smov 64   ;;  %s601_s12 = smov 4  }
  0x12   :  { %32 = dma.hbm_to_vmem [thread:$0]  %s730_s3, 1024, %s27_s25, [#allocation3], %s600_s11, %s600_s11, %s601_s12  }
  0x13   :  { %s602_s15 = smov [#allocation5]   ;;  %s549_s19 = scalar_lea.hbm %s732_s5, 1024 }
  0x14   :  { %s40_s16 = sshll.u32 %s602_s15, 4  ;;  %p550_p8 = scmp.ne.s32.totalorder %s732_s5, %s549_s19  ;;  %s41_s16 = int_to_ptr.vmem [resolvable:$true] %s40_s16 }
  0x15   :  { %p553_p9 = scmp.lt.u32.totalorder %s549_s19, %s732_s5 }
  0x17   :  { %p555_p10 = pnand %p553_p9, %p550_p8 }
  0x19   :  { %558 = shalt.err (!%p555_p10)
}
  0x1a   :  { %s559_s24 = scalar_lea.vmem %s41_s16, 1024  ;;  %p564_p12 = scmp.lt.s32.totalorder %s41_s16, %s41_s16 }
  0x1b   :  { %p560_p11 = scmp.ne.s32.totalorder %s41_s16, %s559_s24  ;;  %p565_p13 = scmp.lt.s32.totalorder %s559_s24, %s559_s24 }
  0x1d   :  { %p566_p0 = por %p565_p13, %p564_p12 }
  0x1f   :  { %p567_p1 = pnand %p566_p0, %p560_p11 }
  0x21   :  { %570 = shalt.err (!%p567_p1)
}
  0x22   :  { %46 = dma.hbm_to_vmem [thread:$0]  %s732_s5, 1024, %s41_s16, [#allocation6], %s600_s11, %s600_s11, %s601_s12  }
  0x23   :  { %593 = dma.done.wait [#allocation3], 1024  }
  0x24   :  { %594 = vsyncadd [#allocation3], 4294966272 }
  0x25   :  { %595 = dma.done.wait [#allocation6], 1024  }
  0x26   :  { %596 = vsyncadd [#allocation6], 4294966272  ;;  %v603_v0 = vmov 0.0   ;;  %vm66_vm0 = vcmask 64512   ;;  %v58_v1 = vld [vmem:[%s728_s1] sm:$0xff]  ;;  %v57_v3 = vld [vmem:[%s727_s0 + $0x8] sm:$0xff] }
  0x27   :  { %460 = vmatprep.subr.bf16.mxu1 %v603_v0  ;;  %v56_v2 = vld [vmem:[%s727_s0] sm:$0xff]  ;;  %455 = vmatprep.subr.mxu0 %v58_v1  ;;  %v508_v5 = vld [vmem:[#allocation2 + $0x8] sm:$0xff]   ;;  %v509_v6 = vld [vmem:[#allocation2 + $0x10] sm:$0xff]   ;;  %vm604_vm1 = vmmov 0   ;;  %s605_s13 = smov [#allocation7]  }
  0x28   :  { %457 = vmatprep.mubr.msk.f32.mxu0 %vm66_vm0, %v56_v2  ;;  %v507_v4 = vld [vmem:[#allocation2] sm:$0xff]   ;;  %456 = vmatpush3.msra.mxu0 %v58_v1  ;;  %v510_v7 = vld [vmem:[#allocation2 + $0x18] sm:$0xff]   ;;  %v512_v9 = vld [vmem:[#allocation2 + $0x28] sm:$0xff]   ;;  %s391_s14 = sshll.u32 %s605_s13, 4  ;;  %s392_s14 = int_to_ptr.vmem [resolvable:$true] %s391_s14 }
  0x29   :  { %458 = vmatmul.mubr.msk.f32.vlgmr.msra.gmra.mrb[0].mxu0 %vm66_vm0, %v57_v3  ;;  %461 = vmatpush3.bf16.msra.mxu1 %v507_v4  ;;  %v511_v8 = vld [vmem:[#allocation2 + $0x20] sm:$0xff]   ;;  %v513_v10 = vld [vmem:[#allocation2 + $0x30] sm:$0xff]   ;;  %v514_v11 = vld [vmem:[#allocation2 + $0x38] sm:$0xff]   ;;  %p576_p3 = scmp.lt.s32.totalorder %s392_s14, %s392_s14 }
  0x2a   :  { %462 = vmatprep.subr.bf16.mxu1 %v603_v0  ;;  %480 = vmatprep.subr.bf16.mxu0 %v603_v0  ;;  %v515_v12 = vld [vmem:[#allocation5] sm:$0xff]   ;;  %v516_v13 = vld [vmem:[#allocation5 + $0x8] sm:$0xff]   ;;  %v517_v14 = vld [vmem:[#allocation5 + $0x10] sm:$0xff]  }
  0x2b   :  { %476 = vmatprep.mubr.msk.bf16.mxu1 %vm604_vm1, %v603_v0  ;;  %496 = vmatprep.mubr.msk.bf16.mxu0 %vm604_vm1, %v603_v0  ;;  %v404_v15 = vld [vmem:[%s729_s2] ss:$0 sm:$0xff]  ;;  %v518_v22 = vld [vmem:[#allocation5 + $0x18] sm:$0xff]   ;;  %v520_v24 = vld [vmem:[#allocation5 + $0x28] sm:$0xff]  }
  0x2c   :  { %481 = vmatpush3.bf16.msra.mxu0 %v515_v12  ;;  %v519_v23 = vld [vmem:[#allocation5 + $0x20] sm:$0xff]   ;;  %v521_v25 = vld [vmem:[#allocation5 + $0x30] sm:$0xff]   ;;  %v522_v26 = vld [vmem:[#allocation5 + $0x38] sm:$0xff]  }
  0x2d   :  { %463 = vmatpush3.bf16.msra.mxu1 %v508_v5  ;;  %482 = vmatprep.subr.bf16.mxu0 %v603_v0  ;;  %v407_v27 = vld [vmem:[%s731_s4] ss:$0 sm:$0xff]  ;;  %s571_s4 = scalar_lea.vmem %s392_s14, 128 }
  0x2e   :  { %464 = vmatprep.subr.bf16.mxu1 %v603_v0  ;;  %v416_v36 = vld [vmem:[%s733_s6] ss:$0 sm:$0xff]  ;;  %p572_p2 = scmp.ne.s32.totalorder %s392_s14, %s571_s4  ;;  %p577_p4 = scmp.lt.s32.totalorder %s571_s4, %s571_s4 }
  0x30   :  { %483 = vmatpush3.bf16.msra.mxu0 %v516_v13  ;;  %p578_p5 = por %p577_p4, %p576_p3 }
  0x31   :  { %465 = vmatpush3.bf16.msra.mxu1 %v509_v6  ;;  %484 = vmatprep.subr.bf16.mxu0 %v603_v0 }
  0x32   :  { %466 = vmatprep.subr.bf16.mxu1 %v603_v0  ;;  %p579_p6 = pnand %p578_p5, %p572_p2 }
  0x34   :  { %485 = vmatpush3.bf16.msra.mxu0 %v517_v14 }
  0x35   :  { %467 = vmatpush3.bf16.msra.mxu1 %v510_v7  ;;  %486 = vmatprep.subr.bf16.mxu0 %v603_v0 }
  0x36   :  { %468 = vmatprep.subr.bf16.mxu1 %v603_v0 }
  0x38   :  { %487 = vmatpush3.bf16.msra.mxu0 %v518_v22 }
  0x39   :  { %469 = vmatpush3.bf16.msra.mxu1 %v511_v8  ;;  %488 = vmatprep.subr.bf16.mxu0 %v603_v0 }
  0x3a   :  { %470 = vmatprep.subr.bf16.mxu1 %v603_v0 }
  0x3c   :  { %489 = vmatpush3.bf16.msra.mxu0 %v519_v23 }
  0x3d   :  { %471 = vmatpush3.bf16.msra.mxu1 %v512_v9  ;;  %490 = vmatprep.subr.bf16.mxu0 %v603_v0 }
  0x3e   :  { %472 = vmatprep.subr.bf16.mxu1 %v603_v0 }
  0x40   :  { %491 = vmatpush3.bf16.msra.mxu0 %v520_v24 }
  0x41   :  { %473 = vmatpush3.bf16.msra.mxu1 %v513_v10  ;;  %492 = vmatprep.subr.bf16.mxu0 %v603_v0 }
  0x42   :  { %474 = vmatprep.subr.bf16.mxu1 %v603_v0 }
  0x44   :  { %493 = vmatpush3.bf16.msra.mxu0 %v521_v25 }
  0x45   :  { %475 = vmatpush3.bf16.msra.mxu1 %v514_v11  ;;  %494 = vmatprep.subr.bf16.mxu0 %v603_v0 }
  0x48   :  { %495 = vmatpush3.bf16.msra.mxu0 %v522_v26 }
  0xfc   :  { %v459_v16 = vpop.f32.mrb[0].mxu0 }
  0xfd   :  { %v145_v17 = vadd.f32 %v459_v16, %v404_v15  ;;  %v139_v18 = vpop.f32.mrb[1].mxu0 }
  0xfe   :  { %v140_v19 = vadd.f32 %v404_v15, %v139_v18 }
 0x100   :  { %v148_v20 = vpack.c.bf16 %v145_v17, %v140_v19 }
 0x102   :  { %523 = vtanh.bf16 %v148_v20 }
 0x10d   :  { %v524_v21 = vpop.eup %523 }
 0x10e   :  { %477 = vmatmul.mubr.bf16.vlgmr.msra.gmra.mrb[0].mxu1 %v524_v21 }
 0x1e1   :  { %v255_v28 = vpop.f32.mrb[0].mxu1 }
 0x1e2   :  { %v478_v29 = vpop.f32.mrb[1].mxu1  ;;  %v256_v31 = vadd.f32 %v407_v27, %v255_v28 }
 0x1e3   :  { %v258_v30 = vpop.f32.mrb[2].mxu1 }
 0x1e4   :  { %v259_v32 = vadd.f32 %v407_v27, %v258_v30  ;;  %v479_v33 = vpop.f32.mrb[3].mxu1 }
 0x1e6   :  { %v262_v34 = vpack.c.bf16 %v259_v32, %v256_v31 }
 0x1e8   :  { %525 = vtanh.bf16 %v262_v34 }
 0x1f3   :  { %v526_v35 = vpop.eup %525 }
 0x1f4   :  { %497 = vmatmul.mubr.bf16.vlgmr.msra.gmra.mrb[4].mxu0 %v526_v35 }
 0x2c7   :  { %v369_v37 = vpop.f32.mrb[4].mxu0 }
 0x2c8   :  { %v498_v38 = vpop.f32.mrb[5].mxu0  ;;  %v370_v40 = vadd.f32 %v416_v36, %v369_v37 }
 0x2c9   :  { %v372_v39 = vpop.f32.mrb[6].mxu0 }
 0x2ca   :  { %v373_v41 = vadd.f32 %v416_v36, %v372_v39  ;;  %v499_v42 = vpop.f32.mrb[7].mxu0 }
 0x2cc   :  { %v432_v43 = vpack.c.bf16 %v373_v41, %v370_v40 }
 0x2ce   :  { %433 = vst [vmem:[#allocation7] sm:$0xff] %v432_v43  }
 0x2cf   :  { %582 = shalt.err (!%p579_p6)
}
 0x2d0   :  { %s583_s16 = scalar_lea.hbm %s734_s7, 128 }
 0x2d1   :  { %p584_p7 = scmp.ne.s32.totalorder %s734_s7, %s583_s16  ;;  %p587_p8 = scmp.lt.u32.totalorder %s583_s16, %s734_s7 }
 0x2d3   :  { %p589_p9 = pnand %p587_p8, %p584_p7 }
 0x2d5   :  { %592 = shalt.err (!%p589_p9)
}
 0x2d6   :  { %397 = dma.vmem_to_hbm [thread:$0]  %s392_s14, 128, %s734_s7, [#allocation4], %s600_s11, %s600_s11, %s601_s12  }
 0x2d7   :  { %597 = dma.done.wait [#allocation4], 128  }
 0x2d8   :  { %598 = vsyncadd [#allocation4], 4294967168 }
 0x2d9   :  { %401 = vsyncpa [#allocation3], 1 }
 0x2da   :  { %402 = vsyncpa [#allocation6], 1 }
 0x2db   :  { %403 = vsyncpa [#allocation4], 1 }

</bundles_post_ra>
